<compile_context>
chip_gen: v5e
topology: v5e:2x2
jax: 0.10.0
libtpu: 0.0.40
codegen_flags: <defaults>
</compile_context>

<pallas_src>
import functools

import jax
import jax.numpy as jnp
from jax import lax
from jax.experimental import pallas as pl
from jax.experimental.pallas import tpu as pltpu

_LN_EPS = 1e-5


def _pick_tile(dim, preferred, granule):
    """Largest multiple of `granule` <= `preferred` that evenly divides `dim`.

    Falls back to the full dimension (a full-extent block is always legal w.r.t.
    the (8, 128) tiling constraint), which also covers small demo shapes.
    """
    if dim <= preferred:
        return dim
    t = (preferred // granule) * granule
    while t >= granule:
        if dim % t == 0:
            return t
        t -= granule
    return dim


# ---------------------------------------------------------------------------
# Kernel 1: tiled projection matmul  (M, K) @ (K, N) -> (M, N)
#   bf16 inputs, f32 VMEM accumulator, bf16 (or f32) output.
# ---------------------------------------------------------------------------
def _matmul_kernel(x_ref, w_ref, o_ref, acc_ref):
    @pl.when(pl.program_id(2) == 0)
    def _():
        acc_ref[...] = jnp.zeros_like(acc_ref)

    acc_ref[...] += jnp.dot(x_ref[...], w_ref[...],
                            preferred_element_type=jnp.float32)

    @pl.when(pl.program_id(2) == pl.num_programs(2) - 1)
    def _():
        o_ref[...] = acc_ref[...].astype(o_ref.dtype)


def pallas_matmul_tiled(x, w, out_dtype=jnp.bfloat16,
                        tm_pref=256, tn_pref=256, tk_pref=512):
    M, K = x.shape
    K2, N = w.shape
    assert K == K2
    tm = _pick_tile(M, tm_pref, 8)
    tn = _pick_tile(N, tn_pref, 128)
    tk = _pick_tile(K, tk_pref, 128)
    grid = (M // tm, N // tn, K // tk)
    return pl.pallas_call(
        _matmul_kernel,
        out_shape=jax.ShapeDtypeStruct((M, N), out_dtype),
        grid=grid,
        in_specs=[pl.BlockSpec((tm, tk), lambda i, j, k: (i, k)),
                  pl.BlockSpec((tk, tn), lambda i, j, k: (k, j))],
        out_specs=pl.BlockSpec((tm, tn), lambda i, j, k: (i, j)),
        scratch_shapes=[pltpu.VMEM((tm, tn), jnp.float32)],
        compiler_params=pltpu.CompilerParams(
            dimension_semantics=("parallel", "parallel", "arbitrary")),
    )(x, w)


# ---------------------------------------------------------------------------
# Kernel 2: scaled dot-product attention.
#   Grid = (batch*heads, q_tiles).  Scale is pre-folded into Wq, so
#   scores = q @ k^T (dot_general, no explicit transpose), softmax along the
#   full per-head KV axis, normalization via EUP approx reciprocal.
#   K/V for a head stay resident across the inner q-tile axis.
# ---------------------------------------------------------------------------
def _sdp_attention_kernel(q_ref, k_ref, v_ref, ctx_ref, attn_ref):
    q = q_ref[0]                         # (tq, d)  bf16, already scaled
    k = k_ref[0]                         # (s,  d)  bf16
    v = v_ref[0]                         # (s,  d)  bf16
    scores = lax.dot_general(q, k, (((1,), (1,)), ((), ())),
                             preferred_element_type=jnp.float32)   # (tq, s)
    m = jnp.max(scores, axis=-1, keepdims=True)
    e = jnp.exp(scores - m)
    denom = jnp.sum(e, axis=-1, keepdims=True)
    attn = e * pl.reciprocal(denom, approx=True)
    attn_ref[0] = attn.astype(attn_ref.dtype)
    ctx_ref[0] = jnp.dot(attn.astype(v.dtype), v,
                         preferred_element_type=jnp.float32).astype(ctx_ref.dtype)


def pallas_sdp_attention(q, k, v, attn_dtype=jnp.bfloat16, tq_pref=256):
    BH, s, d = q.shape
    tq = _pick_tile(s, tq_pref, 8)
    # TODO(synk): for very long per-head sequences, KV-block (flash-style) this
    # kernel; here the full (s, s) attention matrix is a required output anyway.
    ctx, attn = pl.pallas_call(
        _sdp_attention_kernel,
        out_shape=(jax.ShapeDtypeStruct((BH, s, d), q.dtype),
                   jax.ShapeDtypeStruct((BH, s, s), attn_dtype)),
        grid=(BH, s // tq),
        in_specs=[pl.BlockSpec((1, tq, d), lambda b, i: (b, i, 0)),
                  pl.BlockSpec((1, s, d), lambda b, i: (b, 0, 0)),
                  pl.BlockSpec((1, s, d), lambda b, i: (b, 0, 0))],
        out_specs=(pl.BlockSpec((1, tq, d), lambda b, i: (b, i, 0)),
                   pl.BlockSpec((1, tq, s), lambda b, i: (b, i, 0))),
        compiler_params=pltpu.CompilerParams(
            dimension_semantics=("parallel", "parallel")),
    )(q, k, v)
    return ctx, attn


# ---------------------------------------------------------------------------
# Kernel 3: fused  linear_final + residual add + LayerNorm, tiled over rows.
#   out = LayerNorm(residual + ctx @ Wf^T + bf); LN math in f32.
# ---------------------------------------------------------------------------
def _final_kernel(ctx_ref, res_ref, wf_ref, bf_ref, g_ref, b_ref, o_ref, *, eps):
    y = jnp.dot(ctx_ref[...], wf_ref[...],
                preferred_element_type=jnp.float32)
    y = y + bf_ref[...] + res_ref[...]
    mean = jnp.mean(y, axis=-1, keepdims=True)
    var = jnp.mean(jnp.square(y - mean), axis=-1, keepdims=True)
    normed = (y - mean) * lax.rsqrt(var + eps)
    o_ref[...] = (normed * g_ref[...] + b_ref[...]).astype(o_ref.dtype)


def pallas_linear_residual_layernorm(ctx2d, res2d, wf_t, bf, gamma, beta,
                                     eps=_LN_EPS, tm_pref=256):
    M, D = ctx2d.shape
    tm = _pick_tile(M, tm_pref, 8)
    bf2 = bf.reshape(1, D).astype(jnp.float32)
    g2 = gamma.reshape(1, D).astype(jnp.float32)
    b2 = beta.reshape(1, D).astype(jnp.float32)
    kernel = functools.partial(_final_kernel, eps=eps)
    return pl.pallas_call(
        kernel,
        out_shape=jax.ShapeDtypeStruct((M, D), jnp.float32),
        grid=(M // tm,),
        in_specs=[pl.BlockSpec((tm, D), lambda i: (i, 0)),
                  pl.BlockSpec((tm, D), lambda i: (i, 0)),
                  pl.BlockSpec((D, D), lambda i: (0, 0)),   # weight resident
                  pl.BlockSpec((1, D), lambda i: (0, 0)),
                  pl.BlockSpec((1, D), lambda i: (0, 0)),
                  pl.BlockSpec((1, D), lambda i: (0, 0))],
        out_specs=pl.BlockSpec((tm, D), lambda i: (i, 0)),
        compiler_params=pltpu.CompilerParams(
            dimension_semantics=("parallel",)),
    )(ctx2d, res2d, wf_t, bf2, g2, b2)


# ---------------------------------------------------------------------------
# Full MultiHeadAttention forward (glue in plain JAX, hot paths in Pallas)
# ---------------------------------------------------------------------------
def multi_head_attention(query, key, value, params):
    B, S, Din = query.shape
    H = params["num_heads"]
    Dout = params["wq"].shape[1]
    assert S % H == 0, "the module's .view() requires seq % num_heads == 0"
    assert Din % H == 0
    dim_per_head = Din // H

    residual = query.astype(jnp.float32)

    # Per-head scale, folded into Wq once (removes the per-score multiply).
    scale = float((Dout // H) ** (-0.5))
    wq = (params["wq"].astype(jnp.float32) * scale).astype(jnp.bfloat16)
    wk = params["wk"].astype(jnp.bfloat16)
    wv = params["wv"].astype(jnp.bfloat16)

    if (query is key) and (key is value):
        # Self-attention: fused QKV projection — one pass over the activation.
        x = query.reshape(B * S, Din).astype(jnp.bfloat16)
        w_qkv = jnp.concatenate([wq, wk, wv], axis=1)          # (Din, 3*Dout)
        qkv = pallas_matmul_tiled(x, w_qkv)
        q, k, v = jnp.split(qkv, 3, axis=1)
    else:
        q = pallas_matmul_tiled(query.reshape(B * S, Din).astype(jnp.bfloat16), wq)
        k = pallas_matmul_tiled(key.reshape(B * S, Din).astype(jnp.bfloat16), wk)
        v = pallas_matmul_tiled(value.reshape(B * S, Din).astype(jnp.bfloat16), wv)

    # PyTorch .view(B*H, -1, out_feature): splits the *sequence* axis across heads.
    q = q.reshape(B * H, -1, Dout)
    k = k.reshape(B * H, -1, Dout)
    v = v.reshape(B * H, -1, Dout)

    context, attention = pallas_sdp_attention(q, k, v)

    context2d = context.reshape(-1, dim_per_head * H)          # (B*S, Din)
    assert context2d.shape[0] == B * S, \
        "requires out_feature == in_feature so the residual add is exact"
    # TODO(synk): attn_mask path (masked_fill_) not implemented (forward uses None).

    out2d = pallas_linear_residual_layernorm(
        context2d,
        residual.reshape(B * S, Din),
        params["wf_t"].astype(jnp.bfloat16),
        params["bf"], params["ln_gamma"], params["ln_beta"])
    return out2d.reshape(B, S, Din), attention


# ---------------------------------------------------------------------------
# Pure-JAX reference mirroring the kernel's bf16-in / f32-accumulate policy.
# ---------------------------------------------------------------------------
def _bq(x):
    return x.astype(jnp.bfloat16).astype(jnp.float32)


def ref_forward(query, key, value, p):
    B, S, Din = query.shape
    H = p["num_heads"]
    Dout = p["wq"].shape[1]
    scale = float((Dout // H) ** (-0.5))

    xq = _bq(query.reshape(B * S, Din))
    xk = _bq(key.reshape(B * S, Din))
    xv = _bq(value.reshape(B * S, Din))
    q = xq @ _bq(p["wq"] * scale)
    k = xk @ _bq(p["wk"])
    v = xv @ _bq(p["wv"])
    q = _bq(q).reshape(B * H, -1, Dout)     # kernel stores q/k/v in bf16
    k = _bq(k).reshape(B * H, -1, Dout)
    v = _bq(v).reshape(B * H, -1, Dout)

    scores = jnp.einsum("bij,bkj->bik", q, k)
    attn = jax.nn.softmax(scores, axis=-1)
    ctx = jnp.einsum("bij,bjk->bik", _bq(attn), v)
    ctx2d = _bq(ctx).reshape(B * S, Din)    # kernel's context output is bf16

    out = ctx2d @ _bq(p["wf_t"]) + p["bf"]
    y = query.reshape(B * S, Din) + out
    mean = y.mean(-1, keepdims=True)
    var = jnp.square(y - mean).mean(-1, keepdims=True)
    y = (y - mean) / jnp.sqrt(var + _LN_EPS)
    y = y * p["ln_gamma"] + p["ln_beta"]
    return y.reshape(B, S, Din), attn


if __name__ == "__main__":
    # Small shapes consistent with the module's forward:
    #   seq % num_heads == 0 and out_feature == in_feature.
    B, S = 2, 8
    in_feature, out_feature, num_heads = 32, 32, 4

    root = jax.random.PRNGKey(0)
    ks = jax.random.split(root, 8)

    lin_bound = 1.0 / jnp.sqrt(in_feature)
    params = {
        "num_heads": num_heads,
        # torch.tensor(np.random.randn(in, out)) -> standard-normal init.
        "wq": jax.random.normal(ks[0], (in_feature, out_feature), jnp.float32),
        "wk": jax.random.normal(ks[1], (in_feature, out_feature), jnp.float32),
        "wv": jax.random.normal(ks[2], (in_feature, out_feature), jnp.float32),
        # nn.Linear(in, in): weight is (out, in); stored pre-transposed (in, out).
        "wf_t": (jax.random.uniform(ks[3], (in_feature, in_feature),
                                    jnp.float32, -1.0, 1.0) * lin_bound).T,
        "bf": jax.random.uniform(ks[4], (in_feature,), jnp.float32, -1.0, 1.0) * lin_bound,
        "ln_gamma": jnp.ones((in_feature,), jnp.float32),
        "ln_beta": jnp.zeros((in_feature,), jnp.float32),
    }

    query = 0.25 * jax.random.normal(ks[5], (B, S, in_feature), jnp.float32)
    key_in = 0.25 * jax.random.normal(ks[6], (B, S, in_feature), jnp.float32)
    value = 0.25 * jax.random.normal(ks[7], (B, S, in_feature), jnp.float32)

    # --- cross-attention path (three tiled projection matmuls) ---
    out, attn = multi_head_attention(query, key_in, value, params)
    jax.block_until_ready((out, attn))
    ref_out, ref_attn = ref_forward(query, key_in, value, params)
    assert out.shape == (B, S, in_feature)
    assert attn.shape == (B * num_heads, S // num_heads, S // num_heads)
    assert jnp.allclose(attn.astype(jnp.float32), ref_attn, atol=2e-2, rtol=2e-2), \
        "attention mismatch"
    assert jnp.allclose(out, ref_out, atol=2e-2, rtol=2e-2), "output mismatch"

    # --- self-attention path (fused QKV projection) ---
    out_sa, attn_sa = multi_head_attention(query, query, query, params)
    jax.block_until_ready((out_sa, attn_sa))
    ref_out_sa, ref_attn_sa = ref_forward(query, query, query, params)
    assert jnp.allclose(attn_sa.astype(jnp.float32), ref_attn_sa,
                        atol=2e-2, rtol=2e-2), "self-attention attention mismatch"
    assert jnp.allclose(out_sa, ref_out_sa, atol=2e-2, rtol=2e-2), \
        "self-attention output mismatch"

    print("KERNEL_OK")
</pallas_src>

<mosaic_0001>
module attributes {stable_mosaic.version = 11 : i64} {
  func.func @_matmul_kernel(%arg0: i32, %arg1: i32, %arg2: i32, %arg3: memref<16x32xbf16, #tpu.memory_space<vmem>>, %arg4: memref<32x32xbf16, #tpu.memory_space<vmem>>, %arg5: memref<16x32xbf16, #tpu.memory_space<vmem>>, %arg6: memref<16x32xf32, #tpu.memory_space<vmem>>) attributes {dimension_semantics = [#tpu.dimension_semantics<parallel>, #tpu.dimension_semantics<parallel>, #tpu.dimension_semantics<arbitrary>], iteration_bounds = array<i64: 1, 1, 1>, scalar_prefetch = 0 : i64, scratch_operands = 1 : i64, tpu.core_type = #tpu.core_type<tc>, window_params = [{transform_indices = @transform_0, window_bounds = array<i64: 16, 32>}, {transform_indices = @transform_1, window_bounds = array<i64: 32, 32>}, {transform_indices = @transform_2, window_bounds = array<i64: 16, 32>}]} {
    %c0_i32 = arith.constant 0 : i32
    %0 = arith.cmpi eq, %arg2, %c0_i32 : i32
    %1 = arith.extui %0 : i1 to i32
    %c0_i32_0 = arith.constant 0 : i32
    %2 = arith.cmpi ne, %1, %c0_i32_0 : i32
    scf.if %2 {
      %cst_10 = arith.constant 0.000000e+00 : f32
      %12 = vector.broadcast %cst_10 : f32 to vector<16x32xf32>
      %c0_11 = arith.constant 0 : index
      %c0_12 = arith.constant 0 : index
      %13 = vector.load %arg6[%c0_11, %c0_12] : memref<16x32xf32, #tpu.memory_space<vmem>>, vector<16x32xf32>
      tpu.vector_store %arg6[%c0_11, %c0_12], %12 {strides = array<i32>} : memref<16x32xf32, #tpu.memory_space<vmem>>, vector<16x32xf32>,
    } else {
    }
    %c0 = arith.constant 0 : index
    %c0_1 = arith.constant 0 : index
    %3 = vector.load %arg6[%c0, %c0_1] : memref<16x32xf32, #tpu.memory_space<vmem>>, vector<16x32xf32>
    %c0_2 = arith.constant 0 : index
    %c0_3 = arith.constant 0 : index
    %4 = vector.load %arg3[%c0_2, %c0_3] : memref<16x32xbf16, #tpu.memory_space<vmem>>, vector<16x32xbf16>
    %c0_4 = arith.constant 0 : index
    %c0_5 = arith.constant 0 : index
    %5 = vector.load %arg4[%c0_4, %c0_5] : memref<32x32xbf16, #tpu.memory_space<vmem>>, vector<32x32xbf16>
    %cst = arith.constant dense<0.000000e+00> : vector<16x32xf32>
    %6 = tpu.matmul %4, %5, %cst {dimension_numbers = #tpu.dot_dimension_numbers<[1], [0], [0], [1], [0, 0, 1, 1], [], []>} : vector<16x32xbf16>, vector<32x32xbf16>, vector<16x32xf32> -> vector<16x32xf32>
    %7 = arith.addf %3, %6 : vector<16x32xf32>
    %c0_6 = arith.constant 0 : index
    %c0_7 = arith.constant 0 : index
    %8 = vector.load %arg6[%c0_6, %c0_7] : memref<16x32xf32, #tpu.memory_space<vmem>>, vector<16x32xf32>
    tpu.vector_store %arg6[%c0_6, %c0_7], %7 {strides = array<i32>} : memref<16x32xf32, #tpu.memory_space<vmem>>, vector<16x32xf32>,
    %c0_i32_8 = arith.constant 0 : i32
    %9 = arith.cmpi eq, %arg2, %c0_i32_8 : i32
    %10 = arith.extui %9 : i1 to i32
    %c0_i32_9 = arith.constant 0 : i32
    %11 = arith.cmpi ne, %10, %c0_i32_9 : i32
    scf.if %11 {
      %c0_10 = arith.constant 0 : index
      %c0_11 = arith.constant 0 : index
      %12 = vector.load %arg6[%c0_10, %c0_11] : memref<16x32xf32, #tpu.memory_space<vmem>>, vector<16x32xf32>
      %13 = arith.truncf %12 : vector<16x32xf32> to vector<16x32xbf16>
      %c0_12 = arith.constant 0 : index
      %c0_13 = arith.constant 0 : index
      %14 = vector.load %arg5[%c0_12, %c0_13] : memref<16x32xbf16, #tpu.memory_space<vmem>>, vector<16x32xbf16>
      tpu.vector_store %arg5[%c0_12, %c0_13], %13 {strides = array<i32>} : memref<16x32xbf16, #tpu.memory_space<vmem>>, vector<16x32xbf16>,
    } else {
    }
    return
  }
  func.func @transform_0(%arg0: i32, %arg1: i32, %arg2: i32) -> (i32, i32) {
    %c0_i32 = arith.constant 0 : i32
    return %arg0, %arg2 : i32, i32
  }
  func.func @transform_1(%arg0: i32, %arg1: i32, %arg2: i32) -> (i32, i32) {
    %c0_i32 = arith.constant 0 : i32
    return %arg2, %arg1 : i32, i32
  }
  func.func @transform_2(%arg0: i32, %arg1: i32, %arg2: i32) -> (i32, i32) {
    %c0_i32 = arith.constant 0 : i32
    return %arg0, %arg1 : i32, i32
  }
}

</mosaic_0001>

<bundles_post_ra>
// kernel: tpu_custom_call.1
= control target key start
LH: loop header
LB: loop body
LE: loop exit
PB: predicated region body
PF: predicated region fallthrough
CT: control target
= control target key end

     0   :  { %7 = vsyncpa [#allocation4], 0  ;;  %s273_s0 = inlined_call_operand.hbm [shape: bf16[16,32], index: 0, kind: input, shape index: {}]   ;;  %s274_s1 = inlined_call_operand.hbm [shape: bf16[32,32], index: 1, kind: input, shape index: {}]   ;;  %s275_s2 = inlined_call_operand.hbm [shape: bf16[16,32], index: 2, kind: output, shape index: {}]  }
   0x1   :  { %8 = vsyncpa [#allocation7], 0 }
   0x2   :  { %9 = vsyncpa [#allocation5], 0  ;;  %s14_s11 = sshll.u32 %s273_s0, 4  ;;  %s229_s12 = smov [#allocation3]   ;;  %s15_s11 = int_to_ptr.hbm [resolvable:$true] %s14_s11 }
   0x3   :  { %s16_s13 = sshll.u32 %s229_s12, 4  ;;  %s27_s16 = sshll.u32 %s274_s1, 4  ;;  %s17_s13 = int_to_ptr.vmem [resolvable:$true] %s16_s13  ;;  %s28_s16 = int_to_ptr.hbm [resolvable:$true] %s27_s16 }
   0x4   :  { %s230_s17 = smov 64   ;;  %s231_s18 = smov 4  }
   0x5   :  { %22 = dma.hbm_to_vmem [thread:$0]  %s15_s11, 128, %s17_s13, [#allocation4], %s230_s17, %s230_s17, %s231_s18  }
   0x6   :  { %s232_s19 = smov [#allocation6]  }
   0x7   :  { %s29_s20 = sshll.u32 %s232_s19, 4  ;;  %s30_s20 = int_to_ptr.vmem [resolvable:$true] %s29_s20 }
   0x8   :  { %35 = dma.hbm_to_vmem [thread:$0]  %s28_s16, 256, %s30_s20, [#allocation7], %s230_s17, %s230_s17, %s231_s18  }
   0x9   :  { %223 = dma.done.wait [#allocation4], 128  }
   0xa   :  { %224 = vsyncadd [#allocation4], 4294967168 }
   0xb   :  { %225 = dma.done.wait [#allocation7], 256  }
   0xc   :  { %226 = vsyncadd [#allocation7], 4294967040  ;;  %vm49_vm0 = vcmask 261120   ;;  %v233_v0 = vmov 0.0   ;;  %v144_v1 = vld [vmem:[#allocation6 + $0x8] sm:$0xff]  ;;  %v143_v2 = vld [vmem:[#allocation6] sm:$0xff] }
   0xd   :  { %50 = vst.msk [vmem:[#allocation2] sm:$0xff] %vm49_vm0, %v233_v0  ;;  %87 = vmatpush.bf16.msra.mxu0 %v144_v1  ;;  %v142_v3 = vld [vmem:[#allocation3] sm:$0xff]  ;;  %vm106_vm1 = vcmask 257024   ;;  %s234_s0 = smov [#allocation8]   ;;  %s115_s23 = sshll.u32 %s275_s2, 4  ;;  %s116_s23 = int_to_ptr.hbm [resolvable:$true] %s115_s23 }
   0xe   :  { %51 = vst.msk [vmem:[#allocation2 + $0x8] sm:$0xff] %vm49_vm0, %v233_v0  ;;  %s113_s1 = sshll.u32 %s234_s0, 4  ;;  %s114_s1 = int_to_ptr.vmem [resolvable:$true] %s113_s1 }
  0x11   :  { %88 = vmatpush.bf16.msra.mxu0 %v143_v2 }
  0x14   :  { %141 = vmatmul.msk.bf16.vlgmr.msra.gmra.mxu0 %vm49_vm0, %v142_v3  ;;  %v52_v4 = vld [vmem:[#allocation2] sm:$0xff] }
  0x15   :  { %v53_v7 = vld [vmem:[#allocation2 + $0x8] sm:$0xff] }
  0x91   :  { %v90_v5 = vpop.f32.mrf.mxu0 }
  0x92   :  { %v95_v6 = vadd.f32 %v90_v5, %v52_v4 }
  0x94   :  { %97 = vst.msk [vmem:[#allocation2] sm:$0xff] %vm49_vm0, %v95_v6 }
  0x99   :  { %v92_v8 = vpop.f32.mrf.mxu0 }
  0x9a   :  { %v96_v9 = vadd.f32 %v92_v8, %v53_v7 }
  0x9b   :  { %v102_v10 = vld [vmem:[#allocation2] sm:$0xff] }
  0x9c   :  { %98 = vst.msk [vmem:[#allocation2 + $0x8] sm:$0xff] %vm49_vm0, %v96_v9  ;;  %v104_v11 = vpack.c.bf16 %v102_v10, %v102_v10 }
  0x9e   :  { %107 = vst.msk [vmem:[#allocation8] sm:$0xf] %vm106_vm1, %v104_v11 }
  0xa3   :  { %v103_v12 = vld [vmem:[#allocation2 + $0x8] sm:$0xff] }
  0xa4   :  { %v105_v13 = vpack.c.bf16 %v103_v12, %v103_v12 }
  0xa6   :  { %108 = vst.msk [vmem:[#allocation8 + $0x4] sm:$0xf] %vm106_vm1, %v105_v13 }
  0xa7   :  { %121 = dma.vmem_to_hbm [thread:$0]  %s114_s1, 128, %s116_s23, [#allocation5], %s230_s17, %s230_s17, %s231_s18  }
  0xa8   :  { %227 = dma.done.wait [#allocation5], 128  }
  0xa9   :  { %228 = vsyncadd [#allocation5], 4294967168 }
  0xaa   :  { %126 = vsyncpa [#allocation4], 1 }
  0xab   :  { %127 = vsyncpa [#allocation7], 1 }
  0xac   :  { %128 = vsyncpa [#allocation5], 1 }

</bundles_post_ra>
